<compile_context>
chip_gen: v7x
topology: tpu7x:2x2x1
jax: 0.10.0
libtpu: 0.0.40
codegen_flags: <defaults>
</compile_context>

<pallas_src>
import jax
import jax.numpy as jnp
from jax.experimental import pallas as pl
from jax.experimental.pallas import tpu as pltpu


def _mlp_kernel(x_ref, w1_ref, b1_ref, w2_ref, o_ref):
    # x_ref : (TB, IN)   activation tile (natural row-major layout)
    # w1_ref: (IN, H)    first-layer weight, pre-divided by size_scale
    # b1_ref: (1, H)     first-layer bias (broadcast over rows)
    # w2_ref: (H, OUT)   second-layer weight (no bias)
    # o_ref : (TB, OUT)  output tile
    h = jnp.dot(x_ref[...], w1_ref[...], preferred_element_type=jnp.float32)
    h = jnp.maximum(h + b1_ref[...], 0.0)
    y = jnp.dot(h.astype(w2_ref.dtype), w2_ref[...],
                preferred_element_type=jnp.float32)
    o_ref[...] = jnp.maximum(y, 0.0).astype(o_ref.dtype)


def performance_measurement_forward(x, w1, b1, w2, size_scale, *, tile_b=1024):
    """x: (B, in) f32; w1: (in, 32); b1: (32,); w2: (32, out).

    Weights are stored transposed vs. PyTorch (W1: (in, 32), W2: (32, out)).
    Returns (B, out_features), matching the nn.Module forward.
    """
    B, in_features = x.shape
    hidden = w1.shape[1]
    out_features = w2.shape[1]
    assert tile_b % 8 == 0, "tile_b must be a multiple of 8 sublanes"

    # Fold 1/size_scale into the first-layer weight: (x/s) @ W1 == x @ (W1/s).
    w1s = w1 / jnp.asarray(size_scale, w1.dtype)          # (IN, H)
    b1r = b1.reshape(1, hidden)                           # (1, H)

    # Effective batch tile: as large as possible, never larger than the
    # 8-padded batch itself.
    b_sub = ((B + 7) // 8) * 8
    tb = min(tile_b, b_sub)
    B_pad = pl.cdiv(B, tb) * tb
    if B_pad != B:
        x = jnp.pad(x, ((0, B_pad - B), (0, 0)))

    grid = (B_pad // tb,)
    out = pl.pallas_call(
        _mlp_kernel,
        out_shape=jax.ShapeDtypeStruct((B_pad, out_features), x.dtype),
        grid_spec=pltpu.PrefetchScalarGridSpec(
            num_scalar_prefetch=0,
            grid=grid,
            in_specs=[
                pl.BlockSpec((tb, in_features), lambda i: (i, 0)),
                pl.BlockSpec((in_features, hidden), lambda i: (0, 0)),
                pl.BlockSpec((1, hidden), lambda i: (0, 0)),
                pl.BlockSpec((hidden, out_features), lambda i: (0, 0)),
            ],
            out_specs=pl.BlockSpec((tb, out_features), lambda i: (i, 0)),
        ),
        compiler_params=pltpu.CompilerParams(
            dimension_semantics=("parallel",)),
    )(x, w1s, b1r, w2)

    # Drop batch padding (layout already matches the module's output).
    return out[:B]


def reference_forward(x, w1, b1, w2, size_scale):
    h = jnp.maximum(jnp.dot(x / size_scale, w1) + b1, 0.0)
    return jnp.maximum(jnp.dot(h, w2), 0.0)


if __name__ == "__main__":
    # Module hyper-params (consistent with the nn.Module signature).
    in_features = 16
    out_features = 8
    hidden = 32            # fixed by the module (Linear(in, 32), Linear(32, out))
    size_scale = 4.0

    key = jax.random.PRNGKey(0)
    kx, kw1, kb1, kw2 = jax.random.split(key, 4)

    w1 = jax.random.uniform(
        kw1, (in_features, hidden), dtype=jnp.float32,
        minval=-1.0 / jnp.sqrt(in_features), maxval=1.0 / jnp.sqrt(in_features))
    b1 = jax.random.uniform(
        kb1, (hidden,), dtype=jnp.float32,
        minval=-1.0 / jnp.sqrt(in_features), maxval=1.0 / jnp.sqrt(in_features))
    w2 = jax.random.uniform(
        kw2, (hidden, out_features), dtype=jnp.float32,
        minval=-1.0 / jnp.sqrt(hidden), maxval=1.0 / jnp.sqrt(hidden))

    # Case 1: aligned batch, single tile.
    batch = 256
    x = jax.random.normal(kx, (batch, in_features), dtype=jnp.float32)
    out = jax.block_until_ready(
        performance_measurement_forward(x, w1, b1, w2, size_scale))
    ref = reference_forward(x, w1, b1, w2, size_scale)
    assert out.shape == (batch, out_features)
    assert jnp.allclose(out, ref, atol=1e-5, rtol=1e-5), "mismatch (aligned batch)"

    # Case 2: ragged batch + multi-step grid (exercises padding + tiling path).
    batch2 = 200
    x2 = jax.random.normal(jax.random.PRNGKey(1), (batch2, in_features),
                           dtype=jnp.float32)
    out2 = jax.block_until_ready(
        performance_measurement_forward(x2, w1, b1, w2, size_scale, tile_b=128))
    ref2 = reference_forward(x2, w1, b1, w2, size_scale)
    assert out2.shape == (batch2, out_features)
    assert jnp.allclose(out2, ref2, atol=1e-5, rtol=1e-5), "mismatch (ragged batch)"

    print("KERNEL_OK")
</pallas_src>

<mosaic_0001>
module attributes {stable_mosaic.version = 11 : i64} {
  func.func @_mlp_kernel(%arg0: i32, %arg1: memref<256x16xf32, #tpu.memory_space<vmem>>, %arg2: memref<16x32xf32, #tpu.memory_space<vmem>>, %arg3: memref<1x32xf32, #tpu.memory_space<vmem>>, %arg4: memref<32x8xf32, #tpu.memory_space<vmem>>, %arg5: memref<256x8xf32, #tpu.memory_space<vmem>>) attributes {dimension_semantics = [#tpu.dimension_semantics<parallel>], iteration_bounds = array<i64: 1>, scalar_prefetch = 0 : i64, scratch_operands = 0 : i64, tpu.core_type = #tpu.core_type<tc>, window_params = [{transform_indices = @transform_0, window_bounds = array<i64: 256, 16>}, {pipeline_mode = #tpu.pipeline_mode<synchronous>, transform_indices = @transform_1, window_bounds = array<i64: 16, 32>}, {pipeline_mode = #tpu.pipeline_mode<synchronous>, transform_indices = @transform_2, window_bounds = array<i64: 1, 32>}, {pipeline_mode = #tpu.pipeline_mode<synchronous>, transform_indices = @transform_3, window_bounds = array<i64: 32, 8>}, {transform_indices = @transform_4, window_bounds = array<i64: 256, 8>}]} {
    %c0 = arith.constant 0 : index
    %c0_0 = arith.constant 0 : index
    %0 = vector.load %arg1[%c0, %c0_0] : memref<256x16xf32, #tpu.memory_space<vmem>>, vector<256x16xf32>
    %c0_1 = arith.constant 0 : index
    %c0_2 = arith.constant 0 : index
    %1 = vector.load %arg2[%c0_1, %c0_2] : memref<16x32xf32, #tpu.memory_space<vmem>>, vector<16x32xf32>
    %cst = arith.constant dense<0.000000e+00> : vector<256x32xf32>
    %2 = tpu.matmul %0, %1, %cst {dimension_numbers = #tpu.dot_dimension_numbers<[1], [0], [0], [1], [0, 0, 1, 1], [], []>} : vector<256x16xf32>, vector<16x32xf32>, vector<256x32xf32> -> vector<256x32xf32>
    %c0_3 = arith.constant 0 : index
    %c0_4 = arith.constant 0 : index
    %3 = vector.load %arg3[%c0_3, %c0_4] : memref<1x32xf32, #tpu.memory_space<vmem>>, vector<1x32xf32>
    %4 = vector.broadcast %3 : vector<1x32xf32> to vector<256x32xf32>
    %5 = arith.addf %2, %4 : vector<256x32xf32>
    %cst_5 = arith.constant 0.000000e+00 : f32
    %6 = vector.broadcast %cst_5 : f32 to vector<256x32xf32>
    %7 = arith.maximumf %5, %6 : vector<256x32xf32>
    %c0_6 = arith.constant 0 : index
    %c0_7 = arith.constant 0 : index
    %8 = vector.load %arg4[%c0_6, %c0_7] : memref<32x8xf32, #tpu.memory_space<vmem>>, vector<32x8xf32>
    %cst_8 = arith.constant dense<0.000000e+00> : vector<256x8xf32>
    %9 = tpu.matmul %7, %8, %cst_8 {dimension_numbers = #tpu.dot_dimension_numbers<[1], [0], [0], [1], [0, 0, 1, 1], [], []>} : vector<256x32xf32>, vector<32x8xf32>, vector<256x8xf32> -> vector<256x8xf32>
    %cst_9 = arith.constant 0.000000e+00 : f32
    %10 = vector.broadcast %cst_9 : f32 to vector<256x8xf32>
    %11 = arith.maximumf %9, %10 : vector<256x8xf32>
    %c0_10 = arith.constant 0 : index
    %c0_11 = arith.constant 0 : index
    %12 = vector.load %arg5[%c0_10, %c0_11] : memref<256x8xf32, #tpu.memory_space<vmem>>, vector<256x8xf32>
    tpu.vector_store %arg5[%c0_10, %c0_11], %11 {strides = array<i32>} : memref<256x8xf32, #tpu.memory_space<vmem>>, vector<256x8xf32>,
    return
  }
  func.func @transform_0(%arg0: i32) -> (i32, i32) {
    %c0_i32 = arith.constant 0 : i32
    %c0_i32_0 = arith.constant 0 : i32
    return %arg0, %c0_i32 : i32, i32
  }
  func.func @transform_1(%arg0: i32) -> (i32, i32) {
    %c0_i32 = arith.constant 0 : i32
    %c0_i32_0 = arith.constant 0 : i32
    %c0_i32_1 = arith.constant 0 : i32
    return %c0_i32, %c0_i32_0 : i32, i32
  }
  func.func @transform_2(%arg0: i32) -> (i32, i32) {
    %c0_i32 = arith.constant 0 : i32
    %c0_i32_0 = arith.constant 0 : i32
    %c0_i32_1 = arith.constant 0 : i32
    return %c0_i32, %c0_i32_0 : i32, i32
  }
  func.func @transform_3(%arg0: i32) -> (i32, i32) {
    %c0_i32 = arith.constant 0 : i32
    %c0_i32_0 = arith.constant 0 : i32
    %c0_i32_1 = arith.constant 0 : i32
    return %c0_i32, %c0_i32_0 : i32, i32
  }
  func.func @transform_4(%arg0: i32) -> (i32, i32) {
    %c0_i32 = arith.constant 0 : i32
    %c0_i32_0 = arith.constant 0 : i32
    return %arg0, %c0_i32 : i32, i32
  }
}

</mosaic_0001>

<bundles_post_ra>
// kernel: tpu_custom_call.1
= control target key start
LH: loop header
LB: loop body
LE: loop exit
PB: predicated region body
PF: predicated region fallthrough
CT: control target
= control target key end

     0   :  { %vm58_vm0 = vcmask 130048   ;;  %vm416_vm1 = vcmask 261120   ;;  %vm770_vm2 = vcmask 64512   ;;  %s1430_s1 = inlined_call_operand.vmem [shape: f32[16,32], index: 1, kind: input, shape index: {}]   ;;  %s1431_s0 = inlined_call_operand.vmem [shape: f32[256,16], index: 0, kind: input, shape index: {}]   ;;  %s1432_s3 = inlined_call_operand.vmem [shape: f32[32,8], index: 3, kind: input, shape index: {}]   ;;  %s1433_s2 = inlined_call_operand.vmem [shape: f32[1,32], index: 2, kind: input, shape index: {}]   ;;  %s1434_s4 = inlined_call_operand.vmem [shape: f32[256,8], index: 4, kind: output, shape index: {}]  }
   0x1   :  { %v49_v0 = vld [vmem:[%s1430_s1] sm:$0xff]  ;;  %v50_v1 = vld [vmem:[%s1430_s1 + $0x8] sm:$0xff]  ;;  %v19_v5 = vld [vmem:[%s1431_s0 + $0x10] sm:$0xff] }
   0x2   :  { %v17_v2 = vld [vmem:[%s1431_s0] sm:$0xff]  ;;  %v1050_v3 = vpack.c.bf16 %v50_v1, %v49_v0  ;;  %v18_v4 = vld [vmem:[%s1431_s0 + $0x8] sm:$0xff]  ;;  %v20_v6 = vld [vmem:[%s1431_s0 + $0x18] sm:$0xff] }
   0x3   :  { %946 = vmatprep.mubr.msk.f32.mxu0 %vm58_vm0, %v17_v2  ;;  %v21_v7 = vld [vmem:[%s1431_s0 + $0x20] sm:$0xff]  ;;  %v413_v9 = vld [vmem:[%s1432_s3 + $0x8] sm:$0xff]  ;;  %v23_v12 = vld [vmem:[%s1431_s0 + $0x30] sm:$0xff] }
   0x4   :  { %1051 = vmatprep.subr.bf16.mxu0 %v1050_v3  ;;  %v412_v8 = vld [vmem:[%s1432_s3] sm:$0xff]  ;;  %v22_v10 = vld [vmem:[%s1431_s0 + $0x28] sm:$0xff]  ;;  %v24_v13 = vld [vmem:[%s1431_s0 + $0x38] sm:$0xff] }
   0x5   :  { %1053 = vmatpush3.bf16.msra.mxu0 %v1050_v3  ;;  %v1054_v11 = vpack.c.bf16 %v413_v9, %v412_v8  ;;  %v25_v14 = vld [vmem:[%s1431_s0 + $0x40] sm:$0xff]  ;;  %v26_v15 = vld [vmem:[%s1431_s0 + $0x48] sm:$0xff]  ;;  %v27_v16 = vld [vmem:[%s1431_s0 + $0x50] sm:$0xff] }
   0x6   :  { %v28_v17 = vld [vmem:[%s1431_s0 + $0x58] sm:$0xff]  ;;  %v29_v18 = vld [vmem:[%s1431_s0 + $0x60] sm:$0xff]  ;;  %v30_v19 = vld [vmem:[%s1431_s0 + $0x68] sm:$0xff] }
   0x7   :  { %1055 = vmatprep.subr.bf16.mxu1 %v1054_v11  ;;  %v31_v20 = vld [vmem:[%s1431_s0 + $0x70] sm:$0xff]  ;;  %v32_v21 = vld [vmem:[%s1431_s0 + $0x78] sm:$0xff]  ;;  %v33_v22 = vld [vmem:[%s1431_s0 + $0x80] sm:$0xff] }
   0x8   :  { %947 = vmatmul.mubr.msk.f32.vlgmr.msra.gmra.mrb[0].mxu0 %vm58_vm0, %v18_v4  ;;  %1057 = vmatpush3.bf16.msra.mxu1 %v1054_v11  ;;  %v34_v23 = vld [vmem:[%s1431_s0 + $0x88] sm:$0xff]  ;;  %v35_v24 = vld [vmem:[%s1431_s0 + $0x90] sm:$0xff]  ;;  %v36_v25 = vld [vmem:[%s1431_s0 + $0x98] sm:$0xff] }
   0x9   :  { %949 = vmatprep.mubr.msk.f32.mxu0 %vm58_vm0, %v19_v5  ;;  %v37_v26 = vld [vmem:[%s1431_s0 + $0xa0] sm:$0xff]  ;;  %v38_v27 = vld [vmem:[%s1431_s0 + $0xa8] sm:$0xff]  ;;  %v39_v28 = vld [vmem:[%s1431_s0 + $0xb0] sm:$0xff] }
   0xa   :  { %v40_v29 = vld [vmem:[%s1431_s0 + $0xb8] sm:$0xff]  ;;  %v41_v30 = vld [vmem:[%s1431_s0 + $0xc0] sm:$0xff]  ;;  %v42_v31 = vld [vmem:[%s1431_s0 + $0xc8] sm:$0xff] }
   0xb   :  { %v43_v32 = vld [vmem:[%s1431_s0 + $0xd0] sm:$0xff]  ;;  %v44_v33 = vld [vmem:[%s1431_s0 + $0xd8] sm:$0xff]  ;;  %v45_v34 = vld [vmem:[%s1431_s0 + $0xe0] sm:$0xff] }
   0xc   :  { %950 = vmatmul.mubr.msk.f32.gmra.mrb[2].mxu0 %vm58_vm0, %v20_v6  ;;  %v46_v35 = vld [vmem:[%s1431_s0 + $0xe8] sm:$0xff]  ;;  %v47_v36 = vld [vmem:[%s1431_s0 + $0xf0] sm:$0xff]  ;;  %v48_v37 = vld [vmem:[%s1431_s0 + $0xf8] sm:$0xff] }
   0xd   :  { %952 = vmatprep.mubr.msk.f32.mxu0 %vm58_vm0, %v21_v7  ;;  %v414_v38 = vld [vmem:[%s1432_s3 + $0x10] sm:$0xff]  ;;  %v415_v39 = vld [vmem:[%s1432_s3 + $0x18] sm:$0xff]  ;;  %v1236_v41 = vld [vmem:[%s1433_s2] ss:$0 sm:$0xff] }
   0xe   :  { %v1058_v40 = vpack.c.bf16 %v415_v39, %v414_v38 }
  0x10   :  { %953 = vmatmul.mubr.msk.f32.gmra.mrb[4].mxu0 %vm58_vm0, %v22_v10  ;;  %1059 = vmatprep.subr.bf16.mxu1 %v1058_v40 }
  0x11   :  { %955 = vmatprep.mubr.msk.f32.mxu0 %vm58_vm0, %v23_v12  ;;  %1061 = vmatpush3.bf16.msra.mxu1 %v1058_v40 }
  0x14   :  { %956 = vmatmul.mubr.msk.f32.gmra.mrb[6].mxu0 %vm58_vm0, %v24_v13 }
  0x15   :  { %958 = vmatprep.mubr.msk.f32.mxu0 %vm58_vm0, %v25_v14 }
  0x18   :  { %959 = vmatmul.mubr.msk.f32.gmra.mrb[8].mxu0 %vm58_vm0, %v26_v15 }
  0x19   :  { %961 = vmatprep.mubr.msk.f32.mxu0 %vm58_vm0, %v27_v16 }
  0x1c   :  { %962 = vmatmul.mubr.msk.f32.gmra.mrb[10].mxu0 %vm58_vm0, %v28_v17 }
  0x1d   :  { %964 = vmatprep.mubr.msk.f32.mxu0 %vm58_vm0, %v29_v18 }
  0x20   :  { %965 = vmatmul.mubr.msk.f32.gmra.mrb[12].mxu0 %vm58_vm0, %v30_v19 }
  0x21   :  { %967 = vmatprep.mubr.msk.f32.mxu0 %vm58_vm0, %v31_v20 }
  0x24   :  { %968 = vmatmul.mubr.msk.f32.gmra.mrb[14].mxu0 %vm58_vm0, %v32_v21 }
  0x25   :  { %970 = vmatprep.mubr.msk.f32.mxu0 %vm58_vm0, %v33_v22 }
  0x28   :  { %971 = vmatmul.mubr.msk.f32.gmra.mrb[16].mxu0 %vm58_vm0, %v34_v23 }
  0x29   :  { %973 = vmatprep.mubr.msk.f32.mxu0 %vm58_vm0, %v35_v24 }
  0x2c   :  { %974 = vmatmul.mubr.msk.f32.gmra.mrb[18].mxu0 %vm58_vm0, %v36_v25 }
  0x2d   :  { %976 = vmatprep.mubr.msk.f32.mxu0 %vm58_vm0, %v37_v26 }
  0x30   :  { %977 = vmatmul.mubr.msk.f32.gmra.mrb[20].mxu0 %vm58_vm0, %v38_v27 }
  0x31   :  { %979 = vmatprep.mubr.msk.f32.mxu0 %vm58_vm0, %v39_v28 }
  0x34   :  { %980 = vmatmul.mubr.msk.f32.gmra.mrb[22].mxu0 %vm58_vm0, %v40_v29 }
  0x35   :  { %982 = vmatprep.mubr.msk.f32.mxu0 %vm58_vm0, %v41_v30 }
  0x38   :  { %983 = vmatmul.mubr.msk.f32.gmra.mrb[24].mxu0 %vm58_vm0, %v42_v31 }
  0x39   :  { %985 = vmatprep.mubr.msk.f32.mxu0 %vm58_vm0, %v43_v32 }
  0x3c   :  { %986 = vmatmul.mubr.msk.f32.gmra.mrb[26].mxu0 %vm58_vm0, %v44_v33 }
  0x3d   :  { %988 = vmatprep.mubr.msk.f32.mxu0 %vm58_vm0, %v45_v34 }
  0x40   :  { %989 = vmatmul.mubr.msk.f32.gmra.mrb[28].mxu0 %vm58_vm0, %v46_v35 }
  0x41   :  { %991 = vmatprep.mubr.msk.f32.mxu0 %vm58_vm0, %v47_v36 }
  0x44   :  { %992 = vmatmul.mubr.msk.f32.gmra.mrb[30].mxu0 %vm58_vm0, %v48_v37 }
  0xdb   :  { %v948_v42 = vpop.f32.mrb[0].mxu0 }
  0xdc   :  { %v227_v43 = vadd.f32 %v948_v42, %v1236_v41  ;;  %v221_v44 = vpop.f32.mrb[1].mxu0 }
  0xdd   :  { %v222_v45 = vadd.f32 %v1236_v41, %v221_v44 }
  0xde   :  { %v381_v48 = vmax.f32 %v227_v43, 0.0 }
  0xdf   :  { %v380_v46 = vmax.f32 %v222_v45, 0.0  ;;  %v951_v47 = vpop.f32.mrb[2].mxu0 }
  0xe0   :  { %v237_v49 = vadd.f32 %v951_v47, %v1236_v41  ;;  %v231_v50 = vpop.f32.mrb[3].mxu0 }
  0xe1   :  { %v232_v51 = vadd.f32 %v1236_v41, %v231_v50  ;;  %1002 = vmatprep.mubr.msk.f32.mxu1 %vm416_vm1, %v380_v46 }
  0xe2   :  { %1003 = vmatmul.mubr.msk.f32.vlgmr.msra.gmra.mrb[0].mxu1 %vm416_vm1, %v381_v48  ;;  %v383_v54 = vmax.f32 %v237_v49, 0.0 }
  0xe3   :  { %v382_v52 = vmax.f32 %v232_v51, 0.0  ;;  %v954_v53 = vpop.f32.mrb[4].mxu0 }
  0xe4   :  { %v247_v55 = vadd.f32 %v954_v53, %v1236_v41  ;;  %v241_v56 = vpop.f32.mrb[5].mxu0 }
  0xe5   :  { %v242_v57 = vadd.f32 %v1236_v41, %v241_v56  ;;  %1005 = vmatprep.mubr.msk.f32.mxu1 %vm416_vm1, %v382_v52 }
  0xe6   :  { %1006 = vmatmul.mubr.msk.f32.gmra.mrb[2].mxu1 %vm416_vm1, %v383_v54  ;;  %v385_v60 = vmax.f32 %v247_v55, 0.0 }
  0xe7   :  { %v384_v58 = vmax.f32 %v242_v57, 0.0  ;;  %v957_v59 = vpop.f32.mrb[6].mxu0 }
  0xe8   :  { %v257_v61 = vadd.f32 %v957_v59, %v1236_v41  ;;  %v251_v62 = vpop.f32.mrb[7].mxu0 }
  0xe9   :  { %v252_v63 = vadd.f32 %v1236_v41, %v251_v62  ;;  %1008 = vmatprep.mubr.msk.f32.mxu1 %vm416_vm1, %v384_v58 }
  0xea   :  { %1009 = vmatmul.mubr.msk.f32.gmra.mrb[4].mxu1 %vm416_vm1, %v385_v60  ;;  %v387_v2 = vmax.f32 %v257_v61, 0.0 }
  0xeb   :  { %v386_v0 = vmax.f32 %v252_v63, 0.0  ;;  %v960_v1 = vpop.f32.mrb[8].mxu0 }
  0xec   :  { %v267_v3 = vadd.f32 %v960_v1, %v1236_v41  ;;  %v261_v4 = vpop.f32.mrb[9].mxu0 }
  0xed   :  { %v262_v5 = vadd.f32 %v1236_v41, %v261_v4  ;;  %1011 = vmatprep.mubr.msk.f32.mxu1 %vm416_vm1, %v386_v0 }
  0xee   :  { %1012 = vmatmul.mubr.msk.f32.gmra.mrb[6].mxu1 %vm416_vm1, %v387_v2  ;;  %v389_v8 = vmax.f32 %v267_v3, 0.0 }
  0xef   :  { %v388_v6 = vmax.f32 %v262_v5, 0.0  ;;  %v963_v7 = vpop.f32.mrb[10].mxu0 }
  0xf0   :  { %v277_v9 = vadd.f32 %v963_v7, %v1236_v41  ;;  %v271_v10 = vpop.f32.mrb[11].mxu0 }
  0xf1   :  { %v272_v11 = vadd.f32 %v1236_v41, %v271_v10  ;;  %1014 = vmatprep.mubr.msk.f32.mxu1 %vm416_vm1, %v388_v6 }
  0xf2   :  { %1015 = vmatmul.mubr.msk.f32.gmra.mrb[8].mxu1 %vm416_vm1, %v389_v8  ;;  %v391_v14 = vmax.f32 %v277_v9, 0.0 }
  0xf3   :  { %v390_v12 = vmax.f32 %v272_v11, 0.0  ;;  %v966_v13 = vpop.f32.mrb[12].mxu0 }
  0xf4   :  { %v287_v15 = vadd.f32 %v966_v13, %v1236_v41  ;;  %v281_v16 = vpop.f32.mrb[13].mxu0 }
  0xf5   :  { %v282_v17 = vadd.f32 %v1236_v41, %v281_v16  ;;  %1017 = vmatprep.mubr.msk.f32.mxu1 %vm416_vm1, %v390_v12 }
  0xf6   :  { %1018 = vmatmul.mubr.msk.f32.gmra.mrb[10].mxu1 %vm416_vm1, %v391_v14  ;;  %v393_v20 = vmax.f32 %v287_v15, 0.0 }
  0xf7   :  { %v392_v18 = vmax.f32 %v282_v17, 0.0  ;;  %v969_v19 = vpop.f32.mrb[14].mxu0 }
  0xf8   :  { %v297_v21 = vadd.f32 %v969_v19, %v1236_v41  ;;  %v291_v22 = vpop.f32.mrb[15].mxu0 }
  0xf9   :  { %v292_v23 = vadd.f32 %v1236_v41, %v291_v22  ;;  %1020 = vmatprep.mubr.msk.f32.mxu1 %vm416_vm1, %v392_v18 }
  0xfa   :  { %1021 = vmatmul.mubr.msk.f32.gmra.mrb[12].mxu1 %vm416_vm1, %v393_v20  ;;  %v395_v26 = vmax.f32 %v297_v21, 0.0 }
  0xfb   :  { %v394_v24 = vmax.f32 %v292_v23, 0.0  ;;  %v972_v25 = vpop.f32.mrb[16].mxu0 }
  0xfc   :  { %v307_v27 = vadd.f32 %v972_v25, %v1236_v41  ;;  %v301_v28 = vpop.f32.mrb[17].mxu0 }
  0xfd   :  { %v302_v29 = vadd.f32 %v1236_v41, %v301_v28  ;;  %1023 = vmatprep.mubr.msk.f32.mxu1 %vm416_vm1, %v394_v24 }
  0xfe   :  { %1024 = vmatmul.mubr.msk.f32.gmra.mrb[14].mxu1 %vm416_vm1, %v395_v26  ;;  %v397_v32 = vmax.f32 %v307_v27, 0.0 }
  0xff   :  { %v396_v30 = vmax.f32 %v302_v29, 0.0  ;;  %v975_v31 = vpop.f32.mrb[18].mxu0 }
 0x100   :  { %v317_v33 = vadd.f32 %v975_v31, %v1236_v41  ;;  %v311_v34 = vpop.f32.mrb[19].mxu0 }
 0x101   :  { %v312_v35 = vadd.f32 %v1236_v41, %v311_v34  ;;  %1026 = vmatprep.mubr.msk.f32.mxu1 %vm416_vm1, %v396_v30 }
 0x102   :  { %1027 = vmatmul.mubr.msk.f32.gmra.mrb[16].mxu1 %vm416_vm1, %v397_v32  ;;  %v399_v38 = vmax.f32 %v317_v33, 0.0 }
 0x103   :  { %v398_v36 = vmax.f32 %v312_v35, 0.0  ;;  %v978_v37 = vpop.f32.mrb[20].mxu0 }
 0x104   :  { %v327_v39 = vadd.f32 %v978_v37, %v1236_v41  ;;  %v321_v40 = vpop.f32.mrb[21].mxu0 }
 0x105   :  { %v322_v42 = vadd.f32 %v1236_v41, %v321_v40  ;;  %1029 = vmatprep.mubr.msk.f32.mxu1 %vm416_vm1, %v398_v36 }
 0x106   :  { %1030 = vmatmul.mubr.msk.f32.gmra.mrb[18].mxu1 %vm416_vm1, %v399_v38  ;;  %v401_v45 = vmax.f32 %v327_v39, 0.0 }
 0x107   :  { %v400_v43 = vmax.f32 %v322_v42, 0.0  ;;  %v981_v44 = vpop.f32.mrb[22].mxu0 }
 0x108   :  { %v337_v46 = vadd.f32 %v981_v44, %v1236_v41  ;;  %v331_v47 = vpop.f32.mrb[23].mxu0 }
 0x109   :  { %v332_v48 = vadd.f32 %v1236_v41, %v331_v47  ;;  %1032 = vmatprep.mubr.msk.f32.mxu1 %vm416_vm1, %v400_v43 }
 0x10a   :  { %1033 = vmatmul.mubr.msk.f32.gmra.mrb[20].mxu1 %vm416_vm1, %v401_v45  ;;  %v403_v51 = vmax.f32 %v337_v46, 0.0 }
 0x10b   :  { %v402_v49 = vmax.f32 %v332_v48, 0.0  ;;  %v984_v50 = vpop.f32.mrb[24].mxu0 }
 0x10c   :  { %v347_v52 = vadd.f32 %v984_v50, %v1236_v41  ;;  %v341_v53 = vpop.f32.mrb[25].mxu0 }
 0x10d   :  { %v342_v54 = vadd.f32 %v1236_v41, %v341_v53  ;;  %1035 = vmatprep.mubr.msk.f32.mxu1 %vm416_vm1, %v402_v49 }
 0x10e   :  { %1036 = vmatmul.mubr.msk.f32.gmra.mrb[22].mxu1 %vm416_vm1, %v403_v51  ;;  %v405_v57 = vmax.f32 %v347_v52, 0.0 }
 0x10f   :  { %v404_v55 = vmax.f32 %v342_v54, 0.0  ;;  %v987_v56 = vpop.f32.mrb[26].mxu0 }
 0x110   :  { %v357_v58 = vadd.f32 %v987_v56, %v1236_v41  ;;  %v351_v59 = vpop.f32.mrb[27].mxu0 }
 0x111   :  { %v352_v60 = vadd.f32 %v1236_v41, %v351_v59  ;;  %1038 = vmatprep.mubr.msk.f32.mxu1 %vm416_vm1, %v404_v55 }
 0x112   :  { %1039 = vmatmul.mubr.msk.f32.gmra.mrb[24].mxu1 %vm416_vm1, %v405_v57  ;;  %v407_v63 = vmax.f32 %v357_v58, 0.0 }
 0x113   :  { %v406_v61 = vmax.f32 %v352_v60, 0.0  ;;  %v990_v62 = vpop.f32.mrb[28].mxu0 }
 0x114   :  { %v367_v0 = vadd.f32 %v990_v62, %v1236_v41  ;;  %v361_v1 = vpop.f32.mrb[29].mxu0 }
 0x115   :  { %v362_v2 = vadd.f32 %v1236_v41, %v361_v1  ;;  %1041 = vmatprep.mubr.msk.f32.mxu1 %vm416_vm1, %v406_v61 }
 0x116   :  { %1042 = vmatmul.mubr.msk.f32.gmra.mrb[26].mxu1 %vm416_vm1, %v407_v63  ;;  %v409_v5 = vmax.f32 %v367_v0, 0.0 }
 0x117   :  { %v408_v3 = vmax.f32 %v362_v2, 0.0  ;;  %v993_v4 = vpop.f32.mrb[30].mxu0 }
 0x118   :  { %v377_v6 = vadd.f32 %v993_v4, %v1236_v41  ;;  %v371_v7 = vpop.f32.mrb[31].mxu0 }
 0x119   :  { %v372_v8 = vadd.f32 %v1236_v41, %v371_v7  ;;  %1044 = vmatprep.mubr.msk.f32.mxu1 %vm416_vm1, %v408_v3 }
 0x11a   :  { %1045 = vmatmul.mubr.msk.f32.gmra.mrb[28].mxu1 %vm416_vm1, %v409_v5  ;;  %v411_v10 = vmax.f32 %v377_v6, 0.0 }
 0x11b   :  { %v410_v9 = vmax.f32 %v372_v8, 0.0 }
 0x11d   :  { %1047 = vmatprep.mubr.msk.f32.mxu1 %vm416_vm1, %v410_v9 }
 0x11e   :  { %1048 = vmatmul.mubr.msk.f32.gmra.mrb[30].mxu1 %vm416_vm1, %v411_v10 }
 0x1b5   :  { %v1004_v11 = vpop.f32.mrb[0].mxu1 }
 0x1b6   :  { %v739_v12 = vmax.f32 %v1004_v11, 0.0  ;;  %v579_v13 = vpop.f32.mrb[1].mxu1 }
 0x1b7   :  { %v738_v14 = vmax.f32 %v579_v13, 0.0 }
 0x1b8   :  { %772 = vst.msk [vmem:[%s1434_s4 + $0x8] sm:$0xff] %vm770_vm2, %v739_v12 }
 0x1b9   :  { %771 = vst.msk [vmem:[%s1434_s4] sm:$0xff] %vm770_vm2, %v738_v14  ;;  %v1007_v41 = vpop.f32.mrb[2].mxu1 }
 0x1ba   :  { %v741_v15 = vmax.f32 %v1007_v41, 0.0  ;;  %v589_v16 = vpop.f32.mrb[3].mxu1 }
 0x1bb   :  { %v740_v17 = vmax.f32 %v589_v16, 0.0 }
 0x1bc   :  { %774 = vst.msk [vmem:[%s1434_s4 + $0x18] sm:$0xff] %vm770_vm2, %v741_v15 }
 0x1bd   :  { %773 = vst.msk [vmem:[%s1434_s4 + $0x10] sm:$0xff] %vm770_vm2, %v740_v17  ;;  %v1010_v18 = vpop.f32.mrb[4].mxu1 }
 0x1be   :  { %v743_v19 = vmax.f32 %v1010_v18, 0.0  ;;  %v599_v20 = vpop.f32.mrb[5].mxu1 }
 0x1bf   :  { %v742_v21 = vmax.f32 %v599_v20, 0.0 }
 0x1c0   :  { %776 = vst.msk [vmem:[%s1434_s4 + $0x28] sm:$0xff] %vm770_vm2, %v743_v19 }
 0x1c1   :  { %775 = vst.msk [vmem:[%s1434_s4 + $0x20] sm:$0xff] %vm770_vm2, %v742_v21  ;;  %v1013_v22 = vpop.f32.mrb[6].mxu1 }
 0x1c2   :  { %v745_v23 = vmax.f32 %v1013_v22, 0.0  ;;  %v609_v24 = vpop.f32.mrb[7].mxu1 }
 0x1c3   :  { %v744_v25 = vmax.f32 %v609_v24, 0.0 }
 0x1c4   :  { %778 = vst.msk [vmem:[%s1434_s4 + $0x38] sm:$0xff] %vm770_vm2, %v745_v23 }
 0x1c5   :  { %777 = vst.msk [vmem:[%s1434_s4 + $0x30] sm:$0xff] %vm770_vm2, %v744_v25  ;;  %v1016_v26 = vpop.f32.mrb[8].mxu1 }
 0x1c6   :  { %v747_v27 = vmax.f32 %v1016_v26, 0.0  ;;  %v619_v28 = vpop.f32.mrb[9].mxu1 }
 0x1c7   :  { %v746_v29 = vmax.f32 %v619_v28, 0.0 }
 0x1c8   :  { %780 = vst.msk [vmem:[%s1434_s4 + $0x48] sm:$0xff] %vm770_vm2, %v747_v27 }
 0x1c9   :  { %779 = vst.msk [vmem:[%s1434_s4 + $0x40] sm:$0xff] %vm770_vm2, %v746_v29  ;;  %v1019_v30 = vpop.f32.mrb[10].mxu1 }
 0x1ca   :  { %v749_v31 = vmax.f32 %v1019_v30, 0.0  ;;  %v629_v32 = vpop.f32.mrb[11].mxu1 }
 0x1cb   :  { %v748_v33 = vmax.f32 %v629_v32, 0.0 }
 0x1cc   :  { %782 = vst.msk [vmem:[%s1434_s4 + $0x58] sm:$0xff] %vm770_vm2, %v749_v31 }
 0x1cd   :  { %781 = vst.msk [vmem:[%s1434_s4 + $0x50] sm:$0xff] %vm770_vm2, %v748_v33  ;;  %v1022_v34 = vpop.f32.mrb[12].mxu1 }
 0x1ce   :  { %v751_v35 = vmax.f32 %v1022_v34, 0.0  ;;  %v639_v36 = vpop.f32.mrb[13].mxu1 }
 0x1cf   :  { %v750_v37 = vmax.f32 %v639_v36, 0.0 }
 0x1d0   :  { %784 = vst.msk [vmem:[%s1434_s4 + $0x68] sm:$0xff] %vm770_vm2, %v751_v35 }
 0x1d1   :  { %783 = vst.msk [vmem:[%s1434_s4 + $0x60] sm:$0xff] %vm770_vm2, %v750_v37  ;;  %v1025_v38 = vpop.f32.mrb[14].mxu1 }
 0x1d2   :  { %v753_v39 = vmax.f32 %v1025_v38, 0.0  ;;  %v649_v40 = vpop.f32.mrb[15].mxu1 }
 0x1d3   :  { %v752_v42 = vmax.f32 %v649_v40, 0.0 }
 0x1d4   :  { %786 = vst.msk [vmem:[%s1434_s4 + $0x78] sm:$0xff] %vm770_vm2, %v753_v39 }
 0x1d5   :  { %785 = vst.msk [vmem:[%s1434_s4 + $0x70] sm:$0xff] %vm770_vm2, %v752_v42  ;;  %v1028_v43 = vpop.f32.mrb[16].mxu1 }
 0x1d6   :  { %v755_v44 = vmax.f32 %v1028_v43, 0.0  ;;  %v659_v45 = vpop.f32.mrb[17].mxu1 }
 0x1d7   :  { %v754_v46 = vmax.f32 %v659_v45, 0.0 }
 0x1d8   :  { %788 = vst.msk [vmem:[%s1434_s4 + $0x88] sm:$0xff] %vm770_vm2, %v755_v44 }
 0x1d9   :  { %787 = vst.msk [vmem:[%s1434_s4 + $0x80] sm:$0xff] %vm770_vm2, %v754_v46  ;;  %v1031_v47 = vpop.f32.mrb[18].mxu1 }
 0x1da   :  { %v757_v48 = vmax.f32 %v1031_v47, 0.0  ;;  %v669_v49 = vpop.f32.mrb[19].mxu1 }
 0x1db   :  { %v756_v50 = vmax.f32 %v669_v49, 0.0 }
 0x1dc   :  { %790 = vst.msk [vmem:[%s1434_s4 + $0x98] sm:$0xff] %vm770_vm2, %v757_v48 }
 0x1dd   :  { %789 = vst.msk [vmem:[%s1434_s4 + $0x90] sm:$0xff] %vm770_vm2, %v756_v50  ;;  %v1034_v51 = vpop.f32.mrb[20].mxu1 }
 0x1de   :  { %v759_v52 = vmax.f32 %v1034_v51, 0.0  ;;  %v679_v53 = vpop.f32.mrb[21].mxu1 }
 0x1df   :  { %v758_v54 = vmax.f32 %v679_v53, 0.0 }
 0x1e0   :  { %792 = vst.msk [vmem:[%s1434_s4 + $0xa8] sm:$0xff] %vm770_vm2, %v759_v52 }
 0x1e1   :  { %791 = vst.msk [vmem:[%s1434_s4 + $0xa0] sm:$0xff] %vm770_vm2, %v758_v54  ;;  %v1037_v55 = vpop.f32.mrb[22].mxu1 }
 0x1e2   :  { %v761_v56 = vmax.f32 %v1037_v55, 0.0  ;;  %v689_v57 = vpop.f32.mrb[23].mxu1 }
 0x1e3   :  { %v760_v58 = vmax.f32 %v689_v57, 0.0 }
 0x1e4   :  { %794 = vst.msk [vmem:[%s1434_s4 + $0xb8] sm:$0xff] %vm770_vm2, %v761_v56 }
 0x1e5   :  { %793 = vst.msk [vmem:[%s1434_s4 + $0xb0] sm:$0xff] %vm770_vm2, %v760_v58  ;;  %v1040_v59 = vpop.f32.mrb[24].mxu1 }
 0x1e6   :  { %v763_v60 = vmax.f32 %v1040_v59, 0.0  ;;  %v699_v61 = vpop.f32.mrb[25].mxu1 }
 0x1e7   :  { %v762_v62 = vmax.f32 %v699_v61, 0.0 }
 0x1e8   :  { %796 = vst.msk [vmem:[%s1434_s4 + $0xc8] sm:$0xff] %vm770_vm2, %v763_v60 }
 0x1e9   :  { %795 = vst.msk [vmem:[%s1434_s4 + $0xc0] sm:$0xff] %vm770_vm2, %v762_v62  ;;  %v1043_v63 = vpop.f32.mrb[26].mxu1 }
 0x1ea   :  { %v765_v0 = vmax.f32 %v1043_v63, 0.0  ;;  %v709_v1 = vpop.f32.mrb[27].mxu1 }
 0x1eb   :  { %v764_v2 = vmax.f32 %v709_v1, 0.0 }
 0x1ec   :  { %798 = vst.msk [vmem:[%s1434_s4 + $0xd8] sm:$0xff] %vm770_vm2, %v765_v0 }
 0x1ed   :  { %797 = vst.msk [vmem:[%s1434_s4 + $0xd0] sm:$0xff] %vm770_vm2, %v764_v2  ;;  %v1046_v3 = vpop.f32.mrb[28].mxu1 }
 0x1ee   :  { %v767_v4 = vmax.f32 %v1046_v3, 0.0  ;;  %v719_v5 = vpop.f32.mrb[29].mxu1 }
 0x1ef   :  { %v766_v6 = vmax.f32 %v719_v5, 0.0 }
 0x1f0   :  { %800 = vst.msk [vmem:[%s1434_s4 + $0xe8] sm:$0xff] %vm770_vm2, %v767_v4 }
 0x1f1   :  { %799 = vst.msk [vmem:[%s1434_s4 + $0xe0] sm:$0xff] %vm770_vm2, %v766_v6  ;;  %v1049_v7 = vpop.f32.mrb[30].mxu1 }
 0x1f2   :  { %v769_v8 = vmax.f32 %v1049_v7, 0.0  ;;  %v729_v9 = vpop.f32.mrb[31].mxu1 }
 0x1f3   :  { %v768_v10 = vmax.f32 %v729_v9, 0.0 }
 0x1f4   :  { %802 = vst.msk [vmem:[%s1434_s4 + $0xf8] sm:$0xff] %vm770_vm2, %v769_v8 }
 0x1f5   :  { %801 = vst.msk [vmem:[%s1434_s4 + $0xf0] sm:$0xff] %vm770_vm2, %v768_v10 }

</bundles_post_ra>
